<compile_context>
chip_gen: v7x
topology: tpu7x:2x2x1
jax: 0.10.0
libtpu: 0.0.40
codegen_flags: <defaults>
</compile_context>

<pallas_src>
import jax
import jax.numpy as jnp
import numpy as np
from jax.experimental import pallas as pl
from jax.experimental.pallas import tpu as pltpu


# Rows of 128 lanes per grid step: 2048 * 128 = 262,144 elements (~1 MiB f32
# per input block; x0 + x1 + out double-buffered ~= 6 MiB VMEM).
TILE_R_MAX = 2048
_GRANULE = 8 * 128  # vreg granule (sublane x lane)


def _mlp_kernel(p_ref, x0_ref, x1_ref, o_ref):
    # p_ref : (9,) f32 in SMEM (scalar-prefetched weights/biases)
    #   [w1_00, w1_01, w1_10, w1_11, b1_0, b1_1, w2_0, w2_1, b2]
    # x0_ref, x1_ref : (tile_r, 128) f32 in VMEM  (feature 0 / feature 1)
    # o_ref          : (tile_r, 128) f32 in VMEM
    w1_00 = p_ref[0]
    w1_01 = p_ref[1]
    w1_10 = p_ref[2]
    w1_11 = p_ref[3]
    b1_0 = p_ref[4]
    b1_1 = p_ref[5]
    w2_0 = p_ref[6]
    w2_1 = p_ref[7]
    b2 = p_ref[8]

    x0 = x0_ref[...]
    x1 = x1_ref[...]

    def sigmoid(z):
        # Single EUP op per element (tanh) instead of exp + divide.
        return 0.5 * jnp.tanh(0.5 * z) + 0.5

    # hidden layer: h_j = sigmoid(x0 * w1[0, j] + x1 * w1[1, j] + b1[j])
    h0 = sigmoid(w1_00 * x0 + w1_10 * x1 + b1_0)
    h1 = sigmoid(w1_01 * x0 + w1_11 * x1 + b1_1)

    # output layer: y = sigmoid(h0 * w2[0] + h1 * w2[1] + b2)
    o_ref[...] = sigmoid(w2_0 * h0 + w2_1 * h1 + b2)


@jax.jit
def neural_network_two_param(x, w10, w11, b1, w2, b2):
    """Forward pass of NeuralNetworkTwoParam.

    x   : (N, 2) float32
    w10 : (2,)   float32   -- trainable row of w1
    w11 : (2,)   float32   -- fixed row of w1
    b1  : (2,)   float32
    w2  : (2, 1) float32
    b2  : (1,)   float32
    returns (N, 1) float32
    """
    # TODO(synk): for tiny batches (N ~ 4) launch overhead dominates; callers
    # should batch many forwards into one call (plain XLA is competitive there).
    x = x.astype(jnp.float32)
    n = x.shape[0]

    # Flatten the 9 parameters into one SMEM-prefetched vector:
    # w1 = vstack((w10, w11)) row-major, then b1, then w2 column, then b2.
    params = jnp.concatenate([
        w10.astype(jnp.float32).reshape(-1),     # w1[0, :]
        w11.astype(jnp.float32).reshape(-1),     # w1[1, :]
        b1.astype(jnp.float32).reshape(-1),
        w2.astype(jnp.float32).reshape(-1),      # (w2[0,0], w2[1,0])
        b2.astype(jnp.float32).reshape(-1),
    ])                                           # (9,)

    # Pad the batch only to the vreg granule (8*128) and fold it onto
    # (rows, 128): sublane-dense AND lane-dense.
    npad = pl.cdiv(n, _GRANULE) * _GRANULE
    rows = npad // 128                           # always a multiple of 8
    xp = jnp.pad(x, ((0, npad - n), (0, 0)))     # (npad, 2)
    x0 = xp[:, 0].reshape(rows, 128)
    x1 = xp[:, 1].reshape(rows, 128)

    tile_r = min(TILE_R_MAX, rows)               # multiple of 8 by construction
    grid = (pl.cdiv(rows, tile_r),)              # ragged tail -> partial block

    out = pl.pallas_call(
        _mlp_kernel,
        out_shape=jax.ShapeDtypeStruct((rows, 128), jnp.float32),
        grid_spec=pltpu.PrefetchScalarGridSpec(
            num_scalar_prefetch=1,
            grid=grid,
            in_specs=[
                pl.BlockSpec((tile_r, 128), lambda i, p: (i, 0)),
                pl.BlockSpec((tile_r, 128), lambda i, p: (i, 0)),
            ],
            out_specs=pl.BlockSpec((tile_r, 128), lambda i, p: (i, 0)),
        ),
        compiler_params=pltpu.CompilerParams(
            dimension_semantics=("parallel",),
            vmem_limit_bytes=32 << 20,
        ),
        cost_estimate=pl.CostEstimate(
            flops=21 * npad,
            transcendentals=3 * npad,
            bytes_accessed=12 * npad,
        ),
    )(params, x0, x1)

    # Unfold back to the flat batch ordering and drop padding.
    return out.reshape(npad, 1)[:n, :]


def _reference(x, w10, w11, b1, w2, b2):
    w1 = jnp.stack([w10, w11], axis=0)
    h = jax.nn.sigmoid(x @ w1 + b1)
    return jax.nn.sigmoid(h @ w2 + b2)


if __name__ == "__main__":
    # Deterministic parameters, exactly as in the module's __init__.
    w10 = jnp.array([-3.0, -1.5], dtype=jnp.float32)
    w11 = jnp.array([1.0, 1.0], dtype=jnp.float32)
    b1 = jnp.array([0.5, -1.5], dtype=jnp.float32)
    w2 = jnp.array([[1.0], [-1.0]], dtype=jnp.float32)
    b2 = jnp.array([-0.4], dtype=jnp.float32)

    key = jax.random.PRNGKey(0)

    # 1) Small XOR-style batch matching the module's dataset (N=4, D=2).
    x_small = jax.random.uniform(key, (4, 2), dtype=jnp.float32)
    out_small = jax.block_until_ready(
        neural_network_two_param(x_small, w10, w11, b1, w2, b2))
    np.testing.assert_allclose(
        np.asarray(out_small),
        np.asarray(_reference(x_small, w10, w11, b1, w2, b2)),
        rtol=1e-5, atol=1e-5)

    # 2) Non-multiple-of-granule batch exercising padding + single-tile grid.
    x_mid = jax.random.uniform(jax.random.PRNGKey(1), (1000, 2),
                               dtype=jnp.float32)
    out_mid = jax.block_until_ready(
        neural_network_two_param(x_mid, w10, w11, b1, w2, b2))
    np.testing.assert_allclose(
        np.asarray(out_mid),
        np.asarray(_reference(x_mid, w10, w11, b1, w2, b2)),
        rtol=1e-5, atol=1e-5)

    # 3) Larger batch exercising a multi-step grid with a partial trailing block.
    x_big = 4.0 * jax.random.normal(jax.random.PRNGKey(2), (263144, 2),
                                    dtype=jnp.float32)
    out_big = jax.block_until_ready(
        neural_network_two_param(x_big, w10, w11, b1, w2, b2))
    np.testing.assert_allclose(
        np.asarray(out_big),
        np.asarray(_reference(x_big, w10, w11, b1, w2, b2)),
        rtol=1e-5, atol=1e-5)

    print("KERNEL_OK")
</pallas_src>

<mosaic_0001>
module attributes {stable_mosaic.version = 11 : i64} {
  func.func @_mlp_kernel(%arg0: i32, %arg1: memref<9xf32, #tpu.memory_space<smem>>, %arg2: memref<8x128xf32, #tpu.memory_space<vmem>>, %arg3: memref<8x128xf32, #tpu.memory_space<vmem>>, %arg4: memref<8x128xf32, #tpu.memory_space<vmem>>) attributes {dimension_semantics = [#tpu.dimension_semantics<parallel>], iteration_bounds = array<i64: 1>, scalar_prefetch = 1 : i64, scratch_operands = 0 : i64, tpu.core_type = #tpu.core_type<tc>, window_params = [{transform_indices = @transform_0, window_bounds = array<i64: 8, 128>}, {transform_indices = @transform_1, window_bounds = array<i64: 8, 128>}, {transform_indices = @transform_2, window_bounds = array<i64: 8, 128>}]} {
    %c0 = arith.constant 0 : index
    %0 = memref.load %arg1[%c0] : memref<9xf32, #tpu.memory_space<smem>>
    %c1 = arith.constant 1 : index
    %1 = memref.load %arg1[%c1] : memref<9xf32, #tpu.memory_space<smem>>
    %c2 = arith.constant 2 : index
    %2 = memref.load %arg1[%c2] : memref<9xf32, #tpu.memory_space<smem>>
    %c3 = arith.constant 3 : index
    %3 = memref.load %arg1[%c3] : memref<9xf32, #tpu.memory_space<smem>>
    %c4 = arith.constant 4 : index
    %4 = memref.load %arg1[%c4] : memref<9xf32, #tpu.memory_space<smem>>
    %c5 = arith.constant 5 : index
    %5 = memref.load %arg1[%c5] : memref<9xf32, #tpu.memory_space<smem>>
    %c6 = arith.constant 6 : index
    %6 = memref.load %arg1[%c6] : memref<9xf32, #tpu.memory_space<smem>>
    %c7 = arith.constant 7 : index
    %7 = memref.load %arg1[%c7] : memref<9xf32, #tpu.memory_space<smem>>
    %c8 = arith.constant 8 : index
    %8 = memref.load %arg1[%c8] : memref<9xf32, #tpu.memory_space<smem>>
    %c0_0 = arith.constant 0 : index
    %c0_1 = arith.constant 0 : index
    %9 = vector.load %arg2[%c0_0, %c0_1] : memref<8x128xf32, #tpu.memory_space<vmem>>, vector<8x128xf32>
    %c0_2 = arith.constant 0 : index
    %c0_3 = arith.constant 0 : index
    %10 = vector.load %arg3[%c0_2, %c0_3] : memref<8x128xf32, #tpu.memory_space<vmem>>, vector<8x128xf32>
    %11 = vector.broadcast %0 : f32 to vector<8x128xf32>
    %12 = arith.mulf %11, %9 : vector<8x128xf32>
    %13 = vector.broadcast %2 : f32 to vector<8x128xf32>
    %14 = arith.mulf %13, %10 : vector<8x128xf32>
    %15 = arith.addf %12, %14 : vector<8x128xf32>
    %16 = vector.broadcast %4 : f32 to vector<8x128xf32>
    %17 = arith.addf %15, %16 : vector<8x128xf32>
    %cst = arith.constant 5.000000e-01 : f32
    %18 = vector.broadcast %cst : f32 to vector<8x128xf32>
    %19 = arith.mulf %18, %17 : vector<8x128xf32>
    %20 = math.tanh %19 : vector<8x128xf32>
    %cst_4 = arith.constant 5.000000e-01 : f32
    %21 = vector.broadcast %cst_4 : f32 to vector<8x128xf32>
    %22 = arith.mulf %21, %20 : vector<8x128xf32>
    %cst_5 = arith.constant 5.000000e-01 : f32
    %23 = vector.broadcast %cst_5 : f32 to vector<8x128xf32>
    %24 = arith.addf %22, %23 : vector<8x128xf32>
    %25 = vector.broadcast %1 : f32 to vector<8x128xf32>
    %26 = arith.mulf %25, %9 : vector<8x128xf32>
    %27 = vector.broadcast %3 : f32 to vector<8x128xf32>
    %28 = arith.mulf %27, %10 : vector<8x128xf32>
    %29 = arith.addf %26, %28 : vector<8x128xf32>
    %30 = vector.broadcast %5 : f32 to vector<8x128xf32>
    %31 = arith.addf %29, %30 : vector<8x128xf32>
    %cst_6 = arith.constant 5.000000e-01 : f32
    %32 = vector.broadcast %cst_6 : f32 to vector<8x128xf32>
    %33 = arith.mulf %32, %31 : vector<8x128xf32>
    %34 = math.tanh %33 : vector<8x128xf32>
    %cst_7 = arith.constant 5.000000e-01 : f32
    %35 = vector.broadcast %cst_7 : f32 to vector<8x128xf32>
    %36 = arith.mulf %35, %34 : vector<8x128xf32>
    %cst_8 = arith.constant 5.000000e-01 : f32
    %37 = vector.broadcast %cst_8 : f32 to vector<8x128xf32>
    %38 = arith.addf %36, %37 : vector<8x128xf32>
    %39 = vector.broadcast %6 : f32 to vector<8x128xf32>
    %40 = arith.mulf %39, %24 : vector<8x128xf32>
    %41 = vector.broadcast %7 : f32 to vector<8x128xf32>
    %42 = arith.mulf %41, %38 : vector<8x128xf32>
    %43 = arith.addf %40, %42 : vector<8x128xf32>
    %44 = vector.broadcast %8 : f32 to vector<8x128xf32>
    %45 = arith.addf %43, %44 : vector<8x128xf32>
    %cst_9 = arith.constant 5.000000e-01 : f32
    %46 = vector.broadcast %cst_9 : f32 to vector<8x128xf32>
    %47 = arith.mulf %46, %45 : vector<8x128xf32>
    %48 = math.tanh %47 : vector<8x128xf32>
    %cst_10 = arith.constant 5.000000e-01 : f32
    %49 = vector.broadcast %cst_10 : f32 to vector<8x128xf32>
    %50 = arith.mulf %49, %48 : vector<8x128xf32>
    %cst_11 = arith.constant 5.000000e-01 : f32
    %51 = vector.broadcast %cst_11 : f32 to vector<8x128xf32>
    %52 = arith.addf %50, %51 : vector<8x128xf32>
    %c0_12 = arith.constant 0 : index
    %c0_13 = arith.constant 0 : index
    %53 = vector.load %arg4[%c0_12, %c0_13] : memref<8x128xf32, #tpu.memory_space<vmem>>, vector<8x128xf32>
    tpu.vector_store %arg4[%c0_12, %c0_13], %52 {strides = array<i32>} : memref<8x128xf32, #tpu.memory_space<vmem>>, vector<8x128xf32>,
    return
  }
  func.func @transform_0(%arg0: i32, %arg1: memref<9xf32, #tpu.memory_space<smem>>) -> (i32, i32) {
    %c0_i32 = arith.constant 0 : i32
    %c0_i32_0 = arith.constant 0 : i32
    return %arg0, %c0_i32 : i32, i32
  }
  func.func @transform_1(%arg0: i32, %arg1: memref<9xf32, #tpu.memory_space<smem>>) -> (i32, i32) {
    %c0_i32 = arith.constant 0 : i32
    %c0_i32_0 = arith.constant 0 : i32
    return %arg0, %c0_i32 : i32, i32
  }
  func.func @transform_2(%arg0: i32, %arg1: memref<9xf32, #tpu.memory_space<smem>>) -> (i32, i32) {
    %c0_i32 = arith.constant 0 : i32
    %c0_i32_0 = arith.constant 0 : i32
    return %arg0, %c0_i32 : i32, i32
  }
}

</mosaic_0001>

<bundles_post_ra>
// kernel: neural_network_two_param.1
= control target key start
LH: loop header
LB: loop body
LE: loop exit
PB: predicated region body
PF: predicated region fallthrough
CT: control target
= control target key end

     0   :  { %s129_s0 = inlined_call_operand.vmem [shape: f32[9], index: 0, kind: input, shape index: {}]   ;;  %s130_s1 = inlined_call_operand.vmem [shape: f32[8,128], index: 1, kind: input, shape index: {}]   ;;  %s131_s2 = inlined_call_operand.vmem [shape: f32[8,128], index: 2, kind: input, shape index: {}]   ;;  %s132_s3 = inlined_call_operand.vmem [shape: f32[8,128], index: 3, kind: output, shape index: {}]  }
   0x1   :  { %s8_s14 = sshll.u32 %s129_s0, 4  ;;  %s9_s14 = int_to_ptr.vmem [resolvable:$true] %s8_s14 }
   0x2   :  { %s82_s15 = scalar_lea.vmem %s9_s14, 16  ;;  %p87_p1 = scmp.lt.s32.totalorder %s9_s14, %s9_s14 }
   0x3   :  { %p83_p0 = scmp.ne.s32.totalorder %s9_s14, %s82_s15  ;;  %p88_p2 = scmp.lt.s32.totalorder %s82_s15, %s82_s15 }
   0x5   :  { %p89_p3 = por %p88_p2, %p87_p1 }
   0x7   :  { %p90_p4 = pnand %p89_p3, %p83_p0 }
   0x9   :  { %93 = shalt.err (!%p90_p4)  }
   0xa   :  { %s96_s16 = smov [#allocation3]  }
   0xb   :  { %11 = dma.vmem_to_smem %s9_s14, 16, %s96_s16, [#allocation2] }
   0xc   :  { %94 = dma.done.wait [#allocation2], 16 }
   0xd   :  { %95 = vsyncadd [#allocation2], 4294967280 }
   0xe   :  { %13 = sfence }
   0xf   :  { %s18_s17 = sld [smem:[#allocation3]]  ;;  %s67_s18 = sld [smem:[#allocation3 + $0x1]]  ;;  %v27_v0 = vld [vmem:[%s130_s1] sm:$0xff] }
  0x10   :  { %s68_s19 = sld [smem:[#allocation3 + $0x2]]  ;;  %s69_s20 = sld [smem:[#allocation3 + $0x3]]  ;;  %v28_v1 = vld [vmem:[%s131_s2] sm:$0xff] }
  0x11   :  { %s70_s21 = sld [smem:[#allocation3 + $0x4]]  ;;  %s71_s22 = sld [smem:[#allocation3 + $0x5]] }
  0x12   :  { %s72_s1 = sld [smem:[#allocation3 + $0x6]]  ;;  %s73_s2 = sld [smem:[#allocation3 + $0x7]] }
  0x13   :  { %s74_s26 = sld [smem:[#allocation3 + $0x8]] }
  0x15   :  { %v29_v2 = vstv %s18_s17  ;;  %v40_v3 = vstv %s67_s18 }
  0x16   :  { %v30_v4 = vmul.f32 %v29_v2, %v27_v0  ;;  %v31_v5 = vstv %s68_s19  ;;  %v41_v6 = vmul.f32 %v40_v3, %v27_v0  ;;  %v42_v7 = vstv %s69_s20 }
  0x17   :  { %v32_v8 = vmul.f32 %v31_v5, %v28_v1  ;;  %v43_v9 = vmul.f32 %v42_v7, %v28_v1  ;;  %v34_v10 = vstv %s70_s21  ;;  %v45_v11 = vstv %s71_s22 }
  0x18   :  { %v51_v22 = vstv %s72_s1  ;;  %v53_v24 = vstv %s73_s2 }
  0x19   :  { %v33_v12 = vadd.f32 %v32_v8, %v30_v4  ;;  %v44_v13 = vadd.f32 %v43_v9, %v41_v6  ;;  %v56_v28 = vstv %s74_s26 }
  0x1b   :  { %v35_v14 = vadd.f32 %v34_v10, %v33_v12  ;;  %v46_v15 = vadd.f32 %v45_v11, %v44_v13 }
  0x1d   :  { %v36_v16 = vmul.f32 0.5, %v35_v14  ;;  %v47_v17 = vmul.f32 0.5, %v46_v15 }
  0x1f   :  { %76 = vtanh.f32 %v36_v16 }
  0x20   :  { %78 = vtanh.f32 %v47_v17 }
  0x29   :  { %v77_v18 = vpop.eup %76 }
  0x2a   :  { %v79_v19 = vpop.eup %78  ;;  %v38_v20 = vmul.f32 0.5, %v77_v18 }
  0x2b   :  { %v49_v21 = vmul.f32 0.5, %v79_v19 }
  0x2c   :  { %v39_v23 = vadd.f32 0.5, %v38_v20 }
  0x2d   :  { %v50_v25 = vadd.f32 0.5, %v49_v21 }
  0x2e   :  { %v52_v26 = vmul.f32 %v51_v22, %v39_v23 }
  0x2f   :  { %v54_v27 = vmul.f32 %v53_v24, %v50_v25 }
  0x31   :  { %v55_v29 = vadd.f32 %v54_v27, %v52_v26 }
  0x33   :  { %v57_v30 = vadd.f32 %v56_v28, %v55_v29 }
  0x35   :  { %v58_v31 = vmul.f32 0.5, %v57_v30 }
  0x37   :  { %80 = vtanh.f32 %v58_v31 }
  0x41   :  { %v81_v32 = vpop.eup %80 }
  0x42   :  { %v60_v33 = vmul.f32 0.5, %v81_v32 }
  0x44   :  { %v61_v34 = vadd.f32 0.5, %v60_v33 }
  0x46   :  { %62 = vst [vmem:[%s132_s3] sm:$0xff] %v61_v34 }

</bundles_post_ra>
